<compile_context>
chip_gen: v7x
topology: tpu7x:2x2x1
jax: 0.10.0
libtpu: 0.0.40
codegen_flags: <defaults>
</compile_context>

<pallas_src>
import functools

import jax
import jax.numpy as jnp
from jax import lax
from jax.experimental import pallas as pl
from jax.experimental.pallas import tpu as pltpu

BN_EPS = 1e-5
RELU_SLOPE = 0.2
MAX_TILE = 65536          # pixels per grid step (lane axis); ~768 KiB / stream


def _round_up(x: int, m: int) -> int:
    return -(-x // m) * m


def _pick_tile(r: int):
    """Return (tile_pixels, padded_pixel_count)."""
    r128 = _round_up(r, 128)
    if r128 <= MAX_TILE:
        return r128, r128
    # Prefer a large divisor of r (no padding copy needed).
    for cand in (65536, 32768, 16384):
        if r % cand == 0:
            return cand, r
    # Otherwise pad to a multiple of MAX_TILE (keeps big tiles; the pad copy
    # is cheaper than paying per-step overhead on tiny tiles).
    return MAX_TILE, _round_up(r, MAX_TILE)


def _pick_chunk(t: int) -> int:
    """Inner compute chunk (lane sub-slice); t is always a multiple of 128."""
    for cand in (512, 256, 128):
        if t % cand == 0:
            return cand
    return t


# ----------------------------------------------------------------------------
# Pass 1: per-batch (mean, centered 3x3 second moment) of the RAW input x.
# Pure VPU/XLU reduction; conv1 statistics are derived algebraically later.
# ----------------------------------------------------------------------------
def _bn_stats_kernel(x_ref, mean_ref, m2_ref):
    # x_ref   : (Cin, T)      channels on sublanes, pixels on lanes
    # mean_ref: (Cin, 1)      running per-batch mean of x
    # m2_ref  : (Cin, Cin)    running centered cross second moment of x
    i = pl.program_id(1)

    @pl.when(i == 0)
    def _init():
        mean_ref[...] = jnp.zeros_like(mean_ref)
        m2_ref[...] = jnp.zeros_like(m2_ref)

    x = x_ref[...].astype(jnp.float32)                       # (Cin, T)
    t = x.shape[1]

    tile_mean = jnp.sum(x, axis=1, keepdims=True) / jnp.float32(t)   # (Cin, 1)
    centred = x - tile_mean
    # 3x3 centered cross moment via VPU broadcast-multiply + lane reduction
    # (avoids a skinny K=T matmul through the MXU).
    tile_m2 = jnp.sum(centred[:, None, :] * centred[None, :, :], axis=-1)

    # Chan / Welford merge of (tile_mean, tile_m2, t) into the running stats.
    prev_count = (i * t).astype(jnp.float32)
    new_count = prev_count + jnp.float32(t)
    delta = tile_mean - mean_ref[...]                        # (Cin, 1)
    douter = jnp.sum(delta[:, None, :] * delta[None, :, :], axis=-1)  # (Cin, Cin)
    mean_ref[...] = mean_ref[...] + delta * (jnp.float32(t) / new_count)
    m2_ref[...] = m2_ref[...] + tile_m2 + douter * (
        prev_count * jnp.float32(t) / new_count)


# ----------------------------------------------------------------------------
# Pass 2: conv1 (scale pre-folded into W1) -> +shift -> LeakyReLU -> conv2+bias.
# Each tile is processed in 128-512 pixel lane sub-chunks so the (64, chunk)
# intermediate stays small while the HBM block stays large.
# ----------------------------------------------------------------------------
def _guided_map_kernel(x_ref, w1_ref, shift_ref, w2_ref, b2_ref, o_ref, *,
                       chunk):
    # x_ref    : (Cin, T)
    # w1_ref   : (C, Cin)   scale-folded conv1 weight
    # shift_ref: (C, 1)     folded  b*(beta - gamma*mean_h*inv_std)
    # w2_ref   : (Cin, C)
    # b2_ref   : (Cin, 1)
    # o_ref    : (Cin, T)
    t = x_ref.shape[1]
    n_chunks = t // chunk                                    # static

    w1 = w1_ref[...]
    w2 = w2_ref[...]
    # Hoist broadcasts out of the inner loop (JAX does not CSE broadcasts).
    shift = jnp.broadcast_to(shift_ref[...], (w1.shape[0], chunk))
    bias = jnp.broadcast_to(b2_ref[...], (w2.shape[0], chunk))

    def body(j, carry):
        off = j * chunk
        if not isinstance(off, int):
            off = pl.multiple_of(off, chunk)
        xc = x_ref[:, pl.ds(off, chunk)].astype(jnp.float32)      # (Cin, chunk)
        h = jnp.dot(w1, xc, preferred_element_type=jnp.float32) + shift
        y = jnp.maximum(h, RELU_SLOPE * h)                        # LeakyReLU(0.2)
        out = jnp.dot(w2, y, preferred_element_type=jnp.float32) + bias
        o_ref[:, pl.ds(off, chunk)] = out.astype(o_ref.dtype)
        return carry

    if n_chunks == 1:
        body(0, 0)
    else:
        lax.fori_loop(0, n_chunks, body, 0,
                      unroll=True if n_chunks <= 8 else 8)


# ----------------------------------------------------------------------------
# Parameters (deterministic, matching GuidedMap.init_weights)
# ----------------------------------------------------------------------------
def make_params(in_channels=3, channels=64, key=jax.random.PRNGKey(42)):
    k_w2, k_b2 = jax.random.split(key)

    # conv1: (channels, in_channels, 1, 1); n_out >= n_in -> zeros + identity diag.
    w1 = jnp.zeros((channels, in_channels), jnp.float32)
    w1 = w1.at[jnp.arange(in_channels), jnp.arange(in_channels)].set(1.0)

    # AdaptiveBatchNorm2d: a=1, b=0; bn.gamma=1, bn.beta=0
    gamma = jnp.ones((channels, 1), jnp.float32)
    beta = jnp.zeros((channels, 1), jnp.float32)
    ab = jnp.array([1.0, 0.0], jnp.float32)

    # conv2: (in_channels, channels, 1, 1); n_out < n_in -> xavier_uniform_.
    fan_in, fan_out = channels, in_channels
    bound = (6.0 / (fan_in + fan_out)) ** 0.5
    w2 = jax.random.uniform(k_w2, (in_channels, channels), jnp.float32,
                            -bound, bound)
    # conv2 bias: PyTorch default uniform(-1/sqrt(fan_in), 1/sqrt(fan_in))
    b_bound = 1.0 / (channels ** 0.5)
    b2 = jax.random.uniform(k_b2, (in_channels, 1), jnp.float32,
                            -b_bound, b_bound)

    return w1, gamma, beta, ab, w2, b2


# ----------------------------------------------------------------------------
# Wrapper
# ----------------------------------------------------------------------------
@jax.jit
def guided_map_forward(x_nchw, params):
    w1, gamma, beta, ab, w2, b2 = params
    n, cin, hh, ww = x_nchw.shape
    c = w1.shape[0]
    r = hh * ww

    t, r_pad = _pick_tile(r)
    num_t = r_pad // t
    chunk = _pick_chunk(t)
    grid = (n, num_t)

    x3 = x_nchw.reshape(n, cin, r)               # NCHW -> (N, Cin, H*W)
    if r_pad != r:
        x3 = jnp.pad(x3, ((0, 0), (0, 0), (0, r_pad - r)))   # zero pad

    x_spec = pl.BlockSpec((None, cin, t), lambda bb, ii: (bb, 0, ii))

    # ---- pass 1: per-batch raw-input moments (no conv1, pure reduction) ----
    mean_b, m2_b = pl.pallas_call(
        _bn_stats_kernel,
        grid=grid,
        in_specs=[x_spec],
        out_specs=(pl.BlockSpec((None, cin, 1), lambda bb, ii: (bb, 0, 0)),
                   pl.BlockSpec((None, cin, cin), lambda bb, ii: (bb, 0, 0))),
        out_shape=(jax.ShapeDtypeStruct((n, cin, 1), jnp.float32),
                   jax.ShapeDtypeStruct((n, cin, cin), jnp.float32)),
        compiler_params=pltpu.CompilerParams(
            dimension_semantics=("parallel", "arbitrary")),
    )(x3)

    # Merge per-batch partials (each covers r_pad pixels -> equal counts).
    mean_pad = jnp.mean(mean_b, axis=0)                       # (Cin, 1)
    dev = mean_b - mean_pad[None]                             # (N, Cin, 1)
    m2_pad = (jnp.sum(m2_b, axis=0)
              + jnp.float32(r_pad) * jnp.sum(dev @ jnp.swapaxes(dev, 1, 2),
                                             axis=0))         # (Cin, Cin)

    # Exactly remove the zero padding's contribution (Chan de-merge).
    n_pad_tot = float(n * r_pad)
    n_valid = float(n * r)
    if r_pad != r:
        z = n_pad_tot - n_valid
        mu_x = mean_pad * (n_pad_tot / n_valid)
        m2_x = m2_pad - jnp.dot(mu_x, mu_x.T) * (n_valid * z / n_pad_tot)
    else:
        mu_x, m2_x = mean_pad, m2_pad
    sigma_x = m2_x / n_valid                                  # biased covariance

    # Moments of h = W1 x, then fold BN + AdaptiveBN into per-channel FMA.
    mean_h = jnp.dot(w1, mu_x)                                          # (C, 1)
    var_h = jnp.maximum(
        jnp.sum(jnp.dot(w1, sigma_x) * w1, axis=1, keepdims=True), 0.0)  # (C, 1)
    a, b = ab[0], ab[1]
    inv_std = lax.rsqrt(var_h + BN_EPS)
    scale = a + b * gamma * inv_std                            # (C, 1)
    shift = b * (beta - gamma * mean_h * inv_std)              # (C, 1)
    w1_folded = scale * w1                                     # scale folded into W1

    # ---- pass 2: conv1 -> +shift -> LeakyReLU -> conv2 + bias --------------
    def resident(shape):           # small params: fetched once, VMEM-resident
        return pl.BlockSpec(shape, lambda bb, ii: (0, 0))

    out3 = pl.pallas_call(
        functools.partial(_guided_map_kernel, chunk=chunk),
        grid=grid,
        in_specs=[x_spec,
                  resident((c, cin)),
                  resident((c, 1)),
                  resident((cin, c)),
                  resident((cin, 1))],
        out_specs=pl.BlockSpec((None, cin, t), lambda bb, ii: (bb, 0, ii)),
        out_shape=jax.ShapeDtypeStruct((n, cin, r_pad), x_nchw.dtype),
        compiler_params=pltpu.CompilerParams(
            dimension_semantics=("parallel", "parallel")),
    )(x3, w1_folded, shift, w2, b2)

    if r_pad != r:
        out3 = out3[:, :, :r]
    return out3.reshape(n, cin, hh, ww)


# ----------------------------------------------------------------------------
# Pure-JAX reference (for correctness check)
# ----------------------------------------------------------------------------
def guided_map_reference(x_nchw, params):
    w1, gamma, beta, ab, w2, b2 = params
    n, cin, hh, ww = x_nchw.shape
    xr = x_nchw.reshape(n, cin, hh * ww).astype(jnp.float32)
    h = jnp.einsum("oc,ncr->nor", w1, xr)                         # conv1 1x1
    mean = jnp.mean(h, axis=(0, 2), keepdims=True)
    var = jnp.mean((h - mean) ** 2, axis=(0, 2), keepdims=True)
    bn = (h - mean) * lax.rsqrt(var + BN_EPS)
    bn = bn * gamma[None, :, :] + beta[None, :, :]
    y = ab[0] * h + ab[1] * bn                                    # AdaptiveBN
    y = jnp.where(y >= 0, y, RELU_SLOPE * y)                      # LeakyReLU
    out = jnp.einsum("oc,ncr->nor", w2, y) + b2[None, :, :]       # conv2 1x1 + bias
    return out.reshape(n, cin, hh, ww).astype(x_nchw.dtype)


if __name__ == "__main__":
    key = jax.random.PRNGKey(0)
    x = jax.random.normal(key, (2, 3, 16, 16), jnp.float32)       # NCHW input

    params = make_params(in_channels=3, channels=64)

    out = jax.block_until_ready(guided_map_forward(x, params))
    assert out.shape == x.shape
    assert bool(jnp.all(jnp.isfinite(out)))
    ref = guided_map_reference(x, params)
    assert jnp.allclose(out, ref, rtol=2e-2, atol=2e-2), \
        float(jnp.max(jnp.abs(out - ref)))

    # Exercise the BN-statistics path with a non-trivial a/b mix.
    w1, gamma, beta, _, w2, b2 = params
    params_bn = (w1, gamma, beta, jnp.array([0.6, 0.4], jnp.float32), w2, b2)
    out_bn = jax.block_until_ready(guided_map_forward(x, params_bn))
    ref_bn = guided_map_reference(x, params_bn)
    assert bool(jnp.all(jnp.isfinite(out_bn)))
    assert jnp.allclose(out_bn, ref_bn, rtol=2e-2, atol=2e-2), \
        float(jnp.max(jnp.abs(out_bn - ref_bn)))

    # Exercise the padded (pixel count not a multiple of 128) path.
    x_odd = jax.random.normal(jax.random.PRNGKey(1), (1, 3, 10, 13), jnp.float32)
    out_odd = jax.block_until_ready(guided_map_forward(x_odd, params_bn))
    ref_odd = guided_map_reference(x_odd, params_bn)
    assert out_odd.shape == x_odd.shape
    assert bool(jnp.all(jnp.isfinite(out_odd)))
    assert jnp.allclose(out_odd, ref_odd, rtol=2e-2, atol=2e-2), \
        float(jnp.max(jnp.abs(out_odd - ref_odd)))

    print("KERNEL_OK")
</pallas_src>

<mosaic_0001>
module attributes {stable_mosaic.version = 11 : i64} {
  func.func @_bn_stats_kernel(%arg0: i32, %arg1: i32, %arg2: memref<1x3x256xf32, #tpu.memory_space<vmem>>, %arg3: memref<1x3x1xf32, #tpu.memory_space<vmem>>, %arg4: memref<1x3x3xf32, #tpu.memory_space<vmem>>) attributes {dimension_semantics = [#tpu.dimension_semantics<parallel>, #tpu.dimension_semantics<arbitrary>], iteration_bounds = array<i64: 2, 1>, scalar_prefetch = 0 : i64, scratch_operands = 0 : i64, tpu.core_type = #tpu.core_type<tc>, window_params = [{transform_indices = @transform_0, window_bounds = array<i64: 1, 3, 256>}, {transform_indices = @transform_1, window_bounds = array<i64: 1, 3, 1>}, {transform_indices = @transform_2, window_bounds = array<i64: 1, 3, 3>}]} {
    %c0_i32 = arith.constant 0 : i32
    %0 = arith.cmpi eq, %arg1, %c0_i32 : i32
    %1 = arith.extui %0 : i1 to i32
    %c0_i32_0 = arith.constant 0 : i32
    %2 = arith.cmpi ne, %1, %c0_i32_0 : i32
    scf.if %2 {
      %cst_24 = arith.constant 0.000000e+00 : f32
      %49 = vector.broadcast %cst_24 : f32 to vector<3x1xf32>
      %c0_25 = arith.constant 0 : index
      %c0_26 = arith.constant 0 : index
      %c0_27 = arith.constant 0 : index
      %50 = vector.load %arg3[%c0_25, %c0_26, %c0_27] : memref<1x3x1xf32, #tpu.memory_space<vmem>>, vector<1x3x1xf32>
      %51 = vector.shape_cast %50 : vector<1x3x1xf32> to vector<3x1xf32>
      %52 = vector.shape_cast %49 : vector<3x1xf32> to vector<1x3x1xf32>
      tpu.vector_store %arg3[%c0_25, %c0_26, %c0_27], %52 {strides = array<i32>} : memref<1x3x1xf32, #tpu.memory_space<vmem>>, vector<1x3x1xf32>,
      %cst_28 = arith.constant 0.000000e+00 : f32
      %53 = vector.broadcast %cst_28 : f32 to vector<3x3xf32>
      %c0_29 = arith.constant 0 : index
      %c0_30 = arith.constant 0 : index
      %c0_31 = arith.constant 0 : index
      %54 = vector.load %arg4[%c0_29, %c0_30, %c0_31] : memref<1x3x3xf32, #tpu.memory_space<vmem>>, vector<1x3x3xf32>
      %55 = vector.shape_cast %54 : vector<1x3x3xf32> to vector<3x3xf32>
      %56 = vector.shape_cast %53 : vector<3x3xf32> to vector<1x3x3xf32>
      tpu.vector_store %arg4[%c0_29, %c0_30, %c0_31], %56 {strides = array<i32>} : memref<1x3x3xf32, #tpu.memory_space<vmem>>, vector<1x3x3xf32>,
    } else {
    }
    %c0 = arith.constant 0 : index
    %c0_1 = arith.constant 0 : index
    %c0_2 = arith.constant 0 : index
    %3 = vector.load %arg2[%c0, %c0_1, %c0_2] : memref<1x3x256xf32, #tpu.memory_space<vmem>>, vector<1x3x256xf32>
    %4 = vector.shape_cast %3 : vector<1x3x256xf32> to vector<3x256xf32>
    %cst = arith.constant dense<0.000000e+00> : vector<3xf32>
    %5 = vector.multi_reduction <add>, %4, %cst [1] : vector<3x256xf32> to vector<3xf32>
    %6 = vector.shape_cast %5 : vector<3xf32> to vector<3x1xf32>
    %cst_3 = arith.constant 2.560000e+02 : f32
    %7 = vector.broadcast %cst_3 : f32 to vector<3x1xf32>
    %8 = arith.divf %6, %7 : vector<3x1xf32>
    %9 = vector.broadcast %8 : vector<3x1xf32> to vector<3x256xf32>
    %10 = arith.subf %4, %9 : vector<3x256xf32>
    %11 = vector.shape_cast %10 : vector<3x256xf32> to vector<3x1x256xf32>
    %12 = vector.shape_cast %10 : vector<3x256xf32> to vector<1x3x256xf32>
    %13 = vector.broadcast %11 : vector<3x1x256xf32> to vector<3x3x256xf32>
    %14 = vector.broadcast %12 : vector<1x3x256xf32> to vector<3x3x256xf32>
    %15 = arith.mulf %13, %14 : vector<3x3x256xf32>
    %cst_4 = arith.constant dense<0.000000e+00> : vector<3x3xf32>
    %16 = vector.multi_reduction <add>, %15, %cst_4 [2] : vector<3x3x256xf32> to vector<3x3xf32>
    %c256_i32 = arith.constant 256 : i32
    %17 = arith.muli %arg1, %c256_i32 : i32
    %18 = arith.sitofp %17 : i32 to f32
    %cst_5 = arith.constant 2.560000e+02 : f32
    %19 = arith.addf %18, %cst_5 : f32
    %c0_6 = arith.constant 0 : index
    %c0_7 = arith.constant 0 : index
    %c0_8 = arith.constant 0 : index
    %20 = vector.load %arg3[%c0_6, %c0_7, %c0_8] : memref<1x3x1xf32, #tpu.memory_space<vmem>>, vector<1x3x1xf32>
    %21 = vector.shape_cast %20 : vector<1x3x1xf32> to vector<3x1xf32>
    %22 = arith.subf %8, %21 : vector<3x1xf32>
    %23 = vector.shape_cast %22 : vector<3x1xf32> to vector<3x1x1xf32>
    %24 = vector.shape_cast %22 : vector<3x1xf32> to vector<1x3x1xf32>
    %25 = vector.broadcast %23 : vector<3x1x1xf32> to vector<3x3x1xf32>
    %26 = vector.broadcast %24 : vector<1x3x1xf32> to vector<3x3x1xf32>
    %27 = arith.mulf %25, %26 : vector<3x3x1xf32>
    %cst_9 = arith.constant dense<0.000000e+00> : vector<3x3xf32>
    %28 = vector.multi_reduction <add>, %27, %cst_9 [2] : vector<3x3x1xf32> to vector<3x3xf32>
    %c0_10 = arith.constant 0 : index
    %c0_11 = arith.constant 0 : index
    %c0_12 = arith.constant 0 : index
    %29 = vector.load %arg3[%c0_10, %c0_11, %c0_12] : memref<1x3x1xf32, #tpu.memory_space<vmem>>, vector<1x3x1xf32>
    %30 = vector.shape_cast %29 : vector<1x3x1xf32> to vector<3x1xf32>
    %cst_13 = arith.constant 2.560000e+02 : f32
    %31 = arith.divf %cst_13, %19 : f32
    %32 = vector.broadcast %31 : f32 to vector<3x1xf32>
    %33 = arith.mulf %22, %32 : vector<3x1xf32>
    %34 = arith.addf %30, %33 : vector<3x1xf32>
    %c0_14 = arith.constant 0 : index
    %c0_15 = arith.constant 0 : index
    %c0_16 = arith.constant 0 : index
    %35 = vector.load %arg3[%c0_14, %c0_15, %c0_16] : memref<1x3x1xf32, #tpu.memory_space<vmem>>, vector<1x3x1xf32>
    %36 = vector.shape_cast %35 : vector<1x3x1xf32> to vector<3x1xf32>
    %37 = vector.shape_cast %34 : vector<3x1xf32> to vector<1x3x1xf32>
    tpu.vector_store %arg3[%c0_14, %c0_15, %c0_16], %37 {strides = array<i32>} : memref<1x3x1xf32, #tpu.memory_space<vmem>>, vector<1x3x1xf32>,
    %c0_17 = arith.constant 0 : index
    %c0_18 = arith.constant 0 : index
    %c0_19 = arith.constant 0 : index
    %38 = vector.load %arg4[%c0_17, %c0_18, %c0_19] : memref<1x3x3xf32, #tpu.memory_space<vmem>>, vector<1x3x3xf32>
    %39 = vector.shape_cast %38 : vector<1x3x3xf32> to vector<3x3xf32>
    %40 = arith.addf %39, %16 : vector<3x3xf32>
    %cst_20 = arith.constant 2.560000e+02 : f32
    %41 = arith.mulf %18, %cst_20 : f32
    %42 = arith.divf %41, %19 : f32
    %43 = vector.broadcast %42 : f32 to vector<3x3xf32>
    %44 = arith.mulf %28, %43 : vector<3x3xf32>
    %45 = arith.addf %40, %44 : vector<3x3xf32>
    %c0_21 = arith.constant 0 : index
    %c0_22 = arith.constant 0 : index
    %c0_23 = arith.constant 0 : index
    %46 = vector.load %arg4[%c0_21, %c0_22, %c0_23] : memref<1x3x3xf32, #tpu.memory_space<vmem>>, vector<1x3x3xf32>
    %47 = vector.shape_cast %46 : vector<1x3x3xf32> to vector<3x3xf32>
    %48 = vector.shape_cast %45 : vector<3x3xf32> to vector<1x3x3xf32>
    tpu.vector_store %arg4[%c0_21, %c0_22, %c0_23], %48 {strides = array<i32>} : memref<1x3x3xf32, #tpu.memory_space<vmem>>, vector<1x3x3xf32>,
    return
  }
  func.func @transform_0(%arg0: i32, %arg1: i32) -> (i32, i32, i32) {
    %c0_i32 = arith.constant 0 : i32
    %c0_i32_0 = arith.constant 0 : i32
    return %arg0, %c0_i32, %arg1 : i32, i32, i32
  }
  func.func @transform_1(%arg0: i32, %arg1: i32) -> (i32, i32, i32) {
    %c0_i32 = arith.constant 0 : i32
    %c0_i32_0 = arith.constant 0 : i32
    %c0_i32_1 = arith.constant 0 : i32
    return %arg0, %c0_i32, %c0_i32_0 : i32, i32, i32
  }
  func.func @transform_2(%arg0: i32, %arg1: i32) -> (i32, i32, i32) {
    %c0_i32 = arith.constant 0 : i32
    %c0_i32_0 = arith.constant 0 : i32
    %c0_i32_1 = arith.constant 0 : i32
    return %arg0, %c0_i32, %c0_i32_0 : i32, i32, i32
  }
}

module attributes {stable_mosaic.version = 11 : i64} {
  func.func @_guided_map_kernel(%arg0: i32, %arg1: i32, %arg2: memref<1x3x256xf32, #tpu.memory_space<vmem>>, %arg3: memref<64x3xf32, #tpu.memory_space<vmem>>, %arg4: memref<64x1xf32, #tpu.memory_space<vmem>>, %arg5: memref<3x64xf32, #tpu.memory_space<vmem>>, %arg6: memref<3x1xf32, #tpu.memory_space<vmem>>, %arg7: memref<1x3x256xf32, #tpu.memory_space<vmem>>) attributes {dimension_semantics = [#tpu.dimension_semantics<parallel>, #tpu.dimension_semantics<parallel>], iteration_bounds = array<i64: 2, 1>, scalar_prefetch = 0 : i64, scratch_operands = 0 : i64, tpu.core_type = #tpu.core_type<tc>, window_params = [{transform_indices = @transform_0, window_bounds = array<i64: 1, 3, 256>}, {pipeline_mode = #tpu.pipeline_mode<synchronous>, transform_indices = @transform_1, window_bounds = array<i64: 64, 3>}, {pipeline_mode = #tpu.pipeline_mode<synchronous>, transform_indices = @transform_2, window_bounds = array<i64: 64, 1>}, {pipeline_mode = #tpu.pipeline_mode<synchronous>, transform_indices = @transform_3, window_bounds = array<i64: 3, 64>}, {pipeline_mode = #tpu.pipeline_mode<synchronous>, transform_indices = @transform_4, window_bounds = array<i64: 3, 1>}, {transform_indices = @transform_5, window_bounds = array<i64: 1, 3, 256>}]} {
    %c0 = arith.constant 0 : index
    %c0_0 = arith.constant 0 : index
    %0 = vector.load %arg3[%c0, %c0_0] : memref<64x3xf32, #tpu.memory_space<vmem>>, vector<64x3xf32>
    %c0_1 = arith.constant 0 : index
    %c0_2 = arith.constant 0 : index
    %1 = vector.load %arg5[%c0_1, %c0_2] : memref<3x64xf32, #tpu.memory_space<vmem>>, vector<3x64xf32>
    %c0_3 = arith.constant 0 : index
    %c0_4 = arith.constant 0 : index
    %2 = vector.load %arg4[%c0_3, %c0_4] : memref<64x1xf32, #tpu.memory_space<vmem>>, vector<64x1xf32>
    %3 = vector.shape_cast %2 : vector<64x1xf32> to vector<64x1xf32>
    %4 = vector.broadcast %3 : vector<64x1xf32> to vector<64x256xf32>
    %c0_5 = arith.constant 0 : index
    %c0_6 = arith.constant 0 : index
    %5 = vector.load %arg6[%c0_5, %c0_6] : memref<3x1xf32, #tpu.memory_space<vmem>>, vector<3x1xf32>
    %6 = vector.shape_cast %5 : vector<3x1xf32> to vector<3x1xf32>
    %7 = vector.broadcast %6 : vector<3x1xf32> to vector<3x256xf32>
    %c0_7 = arith.constant 0 : index
    %c0_8 = arith.constant 0 : index
    %c0_9 = arith.constant 0 : index
    %8 = vector.load %arg2[%c0_7, %c0_8, %c0_9] : memref<1x3x256xf32, #tpu.memory_space<vmem>>, vector<1x3x256xf32>
    %9 = vector.shape_cast %8 : vector<1x3x256xf32> to vector<3x256xf32>
    %cst = arith.constant dense<0.000000e+00> : vector<64x256xf32>
    %10 = tpu.matmul %0, %9, %cst {dimension_numbers = #tpu.dot_dimension_numbers<[1], [0], [0], [1], [0, 0, 1, 1], [], []>} : vector<64x3xf32>, vector<3x256xf32>, vector<64x256xf32> -> vector<64x256xf32>
    %11 = arith.addf %10, %4 : vector<64x256xf32>
    %cst_10 = arith.constant 2.000000e-01 : f32
    %12 = vector.broadcast %cst_10 : f32 to vector<64x256xf32>
    %13 = arith.mulf %12, %11 : vector<64x256xf32>
    %14 = arith.maximumf %11, %13 : vector<64x256xf32>
    %cst_11 = arith.constant dense<0.000000e+00> : vector<3x256xf32>
    %15 = tpu.matmul %1, %14, %cst_11 {dimension_numbers = #tpu.dot_dimension_numbers<[1], [0], [0], [1], [0, 0, 1, 1], [], []>} : vector<3x64xf32>, vector<64x256xf32>, vector<3x256xf32> -> vector<3x256xf32>
    %16 = arith.addf %15, %7 : vector<3x256xf32>
    %c0_12 = arith.constant 0 : index
    %c0_13 = arith.constant 0 : index
    %c0_14 = arith.constant 0 : index
    %17 = vector.load %arg7[%c0_12, %c0_13, %c0_14] : memref<1x3x256xf32, #tpu.memory_space<vmem>>, vector<1x3x256xf32>
    %18 = vector.shape_cast %17 : vector<1x3x256xf32> to vector<3x256xf32>
    %19 = vector.shape_cast %16 : vector<3x256xf32> to vector<1x3x256xf32>
    tpu.vector_store %arg7[%c0_12, %c0_13, %c0_14], %19 {strides = array<i32>} : memref<1x3x256xf32, #tpu.memory_space<vmem>>, vector<1x3x256xf32>,
    return
  }
  func.func @transform_0(%arg0: i32, %arg1: i32) -> (i32, i32, i32) {
    %c0_i32 = arith.constant 0 : i32
    %c0_i32_0 = arith.constant 0 : i32
    return %arg0, %c0_i32, %arg1 : i32, i32, i32
  }
  func.func @transform_1(%arg0: i32, %arg1: i32) -> (i32, i32) {
    %c0_i32 = arith.constant 0 : i32
    %c0_i32_0 = arith.constant 0 : i32
    %c0_i32_1 = arith.constant 0 : i32
    return %c0_i32, %c0_i32_0 : i32, i32
  }
  func.func @transform_2(%arg0: i32, %arg1: i32) -> (i32, i32) {
    %c0_i32 = arith.constant 0 : i32
    %c0_i32_0 = arith.constant 0 : i32
    %c0_i32_1 = arith.constant 0 : i32
    return %c0_i32, %c0_i32_0 : i32, i32
  }
  func.func @transform_3(%arg0: i32, %arg1: i32) -> (i32, i32) {
    %c0_i32 = arith.constant 0 : i32
    %c0_i32_0 = arith.constant 0 : i32
    %c0_i32_1 = arith.constant 0 : i32
    return %c0_i32, %c0_i32_0 : i32, i32
  }
  func.func @transform_4(%arg0: i32, %arg1: i32) -> (i32, i32) {
    %c0_i32 = arith.constant 0 : i32
    %c0_i32_0 = arith.constant 0 : i32
    %c0_i32_1 = arith.constant 0 : i32
    return %c0_i32, %c0_i32_0 : i32, i32
  }
  func.func @transform_5(%arg0: i32, %arg1: i32) -> (i32, i32, i32) {
    %c0_i32 = arith.constant 0 : i32
    %c0_i32_0 = arith.constant 0 : i32
    return %arg0, %c0_i32, %arg1 : i32, i32, i32
  }
}

</mosaic_0001>

<bundles_post_ra>
// kernel: guided_map_forward.2
= control target key start
LH: loop header
LB: loop body
LE: loop exit
PB: predicated region body
PF: predicated region fallthrough
CT: control target
= control target key end

     0   :  { %s594_s9 = smov 0   ;;  %s596_s10 = smov 0   ;;  %s656_s0 = inlined_call_operand.vmem [shape: f32[2,3,256], index: 0, kind: input, shape index: {}]   ;;  %s657_s1 = inlined_call_operand.vmem [shape: f32[2,3,1], index: 1, kind: output, shape index: {0}]   ;;  %s658_s2 = inlined_call_operand.vmem [shape: f32[2,3,3], index: 2, kind: output, shape index: {1}]  }
   0x1   :  { %s598_s11 = smov 0  }
   0x2 LB: > { %s25_s12 = sadd.s32 1, %s569_s10  ;;  %p512_p0 = scmp.ge.s32.totalorder %s573_s11, 1  ;;  %s573_s11 = sphi %s598_s11, %s13_s11   ;;  %s569_s10 = sphi %s596_s10, %s660_s10   ;;  %s565_s9 = sphi %s594_s9, %s659_s9  }
   0x3   : > { %p27_p1 = scmp.ge.s32.totalorder %s25_s12, 2  ;;  %p134_p2 = scmp.lt.s32.totalorder %s573_s11, 3 }
   0x5   : > { %s662_s12 = smov (%p27_p1, %s25_s12), 0  ;;  %p135_p3 = pnand %p512_p0, %p134_p2 }
   0x6   : > { %p164_p4 = scmp.lt.s32.totalorder (!%p135_p3), %s565_s9, 1  ;;  %vm187_vm0 = vcmask (!%p135_p3), 18432   ;;  %vm193_vm1 = vcmask (!%p135_p3), 1042432   ;;  %vm185_vm2 = vcmask (!%p135_p3), 2048   ;;  %v575_v0 = vmov (!%p135_p3), 0.0  }
   0x7   : > { %138 = sbr.rel (%p135_p3) target bundleno = 373 (0x175), region = 24  ;;  %v576_v6 = vmov (!%p135_p3), 0   ;;  %v577_v7 = vmov (!%p135_p3), 839922192   ;;  %v205_v9 = vlaneseq (!%p135_p3)  ;;  %v578_v10 = vmov (!%p135_p3), 1966171168  }
   0x8   : > { %549 = vset.pattern.permute.xlu1 (!%p135_p3), %v576_v6  ;;  %548 = vset.pattern.permute.xlu0 (!%p135_p3), %v576_v6  ;;  %v203_v8 = vunpack.c.l.s4 (!%p135_p3), %v577_v7  ;;  %v213_v11 = vunpack.c.l.s4 (!%p135_p3), %v578_v10  ;;  %vm367_vm3 = vcmask (!%p135_p3), 1042434   ;;  %vm365_vm4 = vcmask (!%p135_p3), 1041409  }
   0x9   : > { %v629_v13 = vshrl.u32 (!%p135_p3), %v205_v9, 7 }
   0xa   : > { %v204_v12 = vunpack.c.0.s8 (!%p135_p3), %v203_v8  ;;  %v214_v14 = vunpack.c.0.s8 (!%p135_p3), %v213_v11 }
   0xb   : > { %v241_v27 = vsub.s32 (!%p135_p3), 1, %v629_v13  ;;  %v237_v28 = vsub.s32 (!%p135_p3), 0, %v629_v13 }
   0xc   : > { %v207_v15 = vsub.s32 (!%p135_p3), %v204_v12, %v629_v13  ;;  %v217_v19 = vsub.s32 (!%p135_p3), %v214_v14, %v629_v13 }
   0xe   : > { %s664_s9 = smov (!%p164_p4, %s565_s9), 1 }
   0xf   : > { %s519_s13 = sshll.u32 %s664_s9, 3  ;;  %s515_s14 = sshll.u32 %s664_s9, 2 }
  0x10   : > { %s171_s17 = scalar_lea.vmem %s656_s0, %s519_s13  ;;  %s618_s20 = scalar_lea.vmem %s658_s2, %s515_s14 }
  0x11   : > { %188 = vst.msk [vmem:[%s618_s20] sm:$0x7] %vm187_vm0, %v575_v0  ;;  %v189_v1 = vld [vmem:[%s171_s17] sm:$0x77]  ;;  %s176_s23 = scalar_lea.vmem %s657_s1, %s515_s14 }
  0x12   : > { %v191_v2 = vcombine.high %v189_v1, %v189_v1  ;;  %v194_v3 = vsel %vm193_vm1, %v189_v1, 0.0  ;;  %186 = vst.msk [vmem:[%s176_s23] sm:$0x7] %vm185_vm2, %v575_v0 }
  0x14   : > { %v195_v4 = vsel %vm193_vm1, %v191_v2, 0.0 }
  0x15   : > { %v196_v5 = vadd.f32 %v195_v4, %v194_v3  ;;  %v352_v3 = vand.u32 127, %v205_v9 }
  0x17   : > { %197 = vadd.xlane.f32.xlu0 %v196_v5  ;;  %v355_v6 = vsub.s32 %v352_v3, %v629_v13 }
  0x19   : > { %v291_v16 = vld [vmem:[%s176_s23] sm:$0x7] }
  0xa4   : > { %v198_v17 = vpop.xlane.xlu0 %197 }
  0xa5   : > { %v200_v18 = vmul.f32 0.00390625, %v198_v17  ;;  %v347_v17 = vld [vmem:[%s618_s20] sm:$0x7] }
  0xa7   : > { %v208_v20 = vrot.slane %v200_v18, %v207_v15  ;;  %v292_v21 = vsub.f32 %v200_v18, %v291_v16 }
  0xa9   : > { %v210_v22 = vsub.f32 %v189_v1, %v208_v20  ;;  %v344_v23 = vadd.f32 %v292_v21, %v291_v16  ;;  %v300_v24 = vrot.slane %v292_v21, %v217_v19 }
  0xab   : > { %346 = vst.msk [vmem:[%s176_s23] sm:$0x7] %vm185_vm2, %v344_v23  ;;  %v301_v25 = vcombine.high %v300_v24, %v300_v24  ;;  %v218_v26 = vrot.slane %v210_v22, %v217_v19  ;;  %v265_v34 = vcombine.high %v210_v22, %v210_v22  ;;  %v308_v42 = vrot.slane %v300_v24, %v217_v19 }
  0xad   : > { %v315_v29 = vrot.slane %v301_v25, %v217_v19  ;;  %v226_v30 = vrot.slane %v218_v26, %v217_v19  ;;  %v320_v43 = vrot.slane %v308_v42, %v237_v28  ;;  %v219_v44 = vcombine.high %v218_v26, %v218_v26 }
  0xae   : > { %v316_v63 = vcombine.high %v308_v42, %v308_v42 }
  0xaf   : > { %v324_v31 = vrot.slane %v315_v29, %v237_v28  ;;  %v238_v32 = vrot.slane %v226_v30, %v237_v28  ;;  %v242_v33 = vrot.slane %v226_v30, %v241_v27  ;;  %v332_v45 = vmul.f32 %v320_v43, %v292_v21 }
  0xb0   : > { %v233_v46 = vrot.slane %v219_v44, %v217_v19  ;;  %v234_v50 = vcombine.high %v226_v30, %v226_v30  ;;  %v328_v0 = vrot.slane %v316_v63, %v237_v28 }
  0xb1   : > { %v333_v35 = vmul.f32 %v324_v31, %v292_v21  ;;  %v267_v36 = vmul.f32 %v238_v32, %v210_v22  ;;  %v268_v37 = vmul.f32 %v265_v34, %v242_v33  ;;  %v377_v47 = vmul.f32 0.0, %v332_v45 }
  0xb2   : > { %v246_v48 = vrot.slane %v233_v46, %v237_v28  ;;  %v250_v49 = vrot.slane %v233_v46, %v241_v27  ;;  %v254_v53 = vrot.slane %v234_v50, %v237_v28  ;;  %v258_v54 = vrot.slane %v234_v50, %v241_v27 }
  0xb3   : > { %v378_v38 = vmul.f32 0.0, %v333_v35  ;;  %v273_v39 = vsel %vm193_vm1, %v267_v36, 0.0  ;;  %v274_v40 = vsel %vm193_vm1, %v268_v37, 0.0  ;;  %v334_v1 = vmul.f32 %v328_v0, %v292_v21 }
  0xb4   : > { %v275_v41 = vadd.f32 %v274_v40, %v273_v39  ;;  %v269_v51 = vmul.f32 %v246_v48, %v210_v22  ;;  %v270_v52 = vmul.f32 %v265_v34, %v250_v49  ;;  %v271_v57 = vmul.f32 %v254_v53, %v210_v22 }
  0xb5   : > { %387 = vperm.xlu1 %549, %v378_v38   ;;  %v272_v58 = vmul.f32 %v265_v34, %v258_v54  ;;  %v379_v2 = vmul.f32 0.0, %v334_v1 }
  0xb6   : > { %276 = vadd.xlane.f32.xlu0 %v275_v41  ;;  %v278_v55 = vsel %vm193_vm1, %v269_v51, 0.0  ;;  %v279_v56 = vsel %vm193_vm1, %v270_v52, 0.0  ;;  %v283_v60 = vsel %vm193_vm1, %v271_v57, 0.0 }
  0xb7   : > { %v280_v59 = vadd.f32 %v279_v56, %v278_v55  ;;  %v284_v61 = vsel %vm193_vm1, %v272_v58, 0.0 }
  0xb8   : > { %v285_v62 = vadd.f32 %v284_v61, %v283_v60 }
  0xcc   : > { %384 = vperm.xlu0 %548, %v377_v47  }
  0xd9   : > { %281 = vadd.xlane.f32.xlu1 %v280_v59 }
  0xdd   : > { %286 = vadd.xlane.f32.xlu1 %v285_v62 }
  0xee   : > { %390 = vperm.xlu1 %549, %v379_v2  }
 0x134   : > { %v388_v4 = vpop.permute.xlu1 %387 }
 0x135   : > { %v399_v19 = vrot.slane %v388_v4, %v355_v6 }
 0x143   : > { %v277_v5 = vpop.xlane.xlu0 %276 }
 0x144   : > { %v356_v11 = vrot.slane %v277_v5, %v355_v6 }
 0x14b   : > { %v385_v10 = vpop.permute.xlu0 %384 }
 0x14c   : > { %v395_v15 = vrot.slane %v385_v10, %v355_v6 }
 0x14e   : > { %v404_v21 = vsel %vm365_vm4, %v399_v19, %v395_v15 }
 0x166   : > { %v282_v7 = vpop.xlane.xlu1 %281 }
 0x167   : > { %v360_v8 = vrot.slane %v282_v7, %v355_v6 }
 0x169   : > { %v366_v16 = vsel %vm365_vm4, %v360_v8, %v356_v11 }
 0x16a   : > { %v287_v12 = vpop.xlane.xlu1 %286 }
 0x16b   : > { %v364_v14 = vrot.slane %v287_v12, %v355_v6 }
 0x16d   : > { %v368_v18 = vsel %vm367_vm3, %v364_v14, %v366_v16 }
 0x16e   : > { %v391_v20 = vpop.permute.xlu1 %390  ;;  %v370_v22 = vadd.f32 %v368_v18, %v347_v17 }
 0x16f   : > { %v403_v9 = vrot.slane %v391_v20, %v355_v6 }
 0x171   : > { %v405_v23 = vsel %vm367_vm3, %v403_v9, %v404_v21 }
 0x172   : > { %v407_v13 = vadd.f32 %v405_v23, %v370_v22 }
 0x174   : > { %409 = vst.msk [vmem:[%s618_s20] sm:$0x7] %vm187_vm0, %v407_v13 }
 0x175 PF: > { %s13_s11 = sadd.s32 1, %s573_s11   ;;  %s659_s9 = smov %s569_s10 }
 0x176   : > { %p10_p5 = scmp.ge.s32.totalorder %s13_s11, 4   ;;  %s660_s10 = smov %s662_s12 }
 0x178   :  { %12 = sbr.rel (!%p10_p5) target bundleno = 2 (0x2), region = 70 }

// kernel: guided_map_forward.3
= control target key start
LH: loop header
LB: loop body
LE: loop exit
PB: predicated region body
PF: predicated region fallthrough
CT: control target
= control target key end

     0   :  { %s797_s18 = smov 0   ;;  %s799_s19 = smov 0   ;;  %s899_s0 = inlined_call_operand.vmem [shape: f32[2,3,256], index: 0, kind: input, shape index: {}]   ;;  %s900_s1 = inlined_call_operand.vmem [shape: f32[64,3], index: 1, kind: input, shape index: {}]   ;;  %s901_s2 = inlined_call_operand.vmem [shape: f32[64,1], index: 2, kind: input, shape index: {}]   ;;  %s902_s3 = inlined_call_operand.vmem [shape: f32[3,64], index: 3, kind: input, shape index: {}]   ;;  %s903_s4 = inlined_call_operand.vmem [shape: f32[3,1], index: 4, kind: input, shape index: {}]   ;;  %s904_s5 = inlined_call_operand.vmem [shape: f32[2,3,256], index: 5, kind: output, shape index: {}]  }
   0x1   :  { %s801_s20 = smov 0  }
   0x2 LB: > { %s27_s21 = sadd.s32 1, %s759_s19  ;;  %p676_p0 = scmp.ge.s32.totalorder %s763_s20, 1  ;;  %s763_s20 = sphi %s801_s20, %s15_s20   ;;  %s759_s19 = sphi %s799_s19, %s906_s19   ;;  %s755_s18 = sphi %s797_s18, %s905_s18  }
   0x3   : > { %p29_p1 = scmp.ge.s32.totalorder %s27_s21, 2  ;;  %p208_p2 = scmp.lt.s32.totalorder %s763_s20, 3 }
   0x5   : > { %s908_s21 = smov (%p29_p1, %s27_s21), 0  ;;  %p209_p3 = pnand %p676_p0, %p208_p2 }
   0x6   : > { %p245_p4 = scmp.lt.s32.totalorder (!%p209_p3), %s755_s18, 1  ;;  %v765_v0 = vmov (!%p209_p3), 0.0   ;;  %v766_v1 = vmov (!%p209_p3), 0   ;;  %v273_v2 = vld [vmem:[%s901_s2] sm:$0xff] (!%p209_p3)  ;;  %v275_v3 = vld [vmem:[%s901_s2 + $0x10] sm:$0xff] (!%p209_p3)  ;;  %v274_v4 = vld [vmem:[%s901_s2 + $0x8] sm:$0xff] (!%p209_p3) }
   0x7   : > { %212 = sbr.rel (%p209_p3) target bundleno = 493 (0x1ed), region = 40  ;;  %424 = vmatprep.mubr.f32.mxu0 (!%p209_p3), %v765_v0  ;;  %573 = vmatprep.mubr.f32.mxu1 (!%p209_p3), %v765_v0  ;;  %v276_v5 = vld [vmem:[%s901_s2 + $0x18] sm:$0xff] (!%p209_p3)  ;;  %vm355_vm0 = vcmask (!%p209_p3), 1042432   ;;  %v264_v8 = vld [vmem:[%s900_s1] sm:$0xff] (!%p209_p3)  ;;  %vm330_vm1 = vcmask (!%p209_p3), 23552   ;;  %v278_v10 = vld [vmem:[%s901_s2 + $0x28] sm:$0xff] (!%p209_p3) }
   0x8   : > { %738 = vset.pattern.permute.xlu0 (!%p209_p3), %v766_v1  ;;  %739 = vset.pattern.permute.xlu1 (!%p209_p3), %v766_v1  ;;  %v277_v9 = vld [vmem:[%s901_s2 + $0x20] sm:$0xff] (!%p209_p3)  ;;  %v265_v11 = vld [vmem:[%s900_s1 + $0x8] sm:$0xff] (!%p209_p3)  ;;  %v279_v12 = vld [vmem:[%s901_s2 + $0x30] sm:$0xff] (!%p209_p3)  ;;  %vm505_vm2 = vcmask (!%p209_p3), 523264  }
   0x9   : > { %283 = vperm.xlu0 (!%p209_p3), %738, %v273_v2   ;;  %293 = vperm.xlu1 (!%p209_p3), %739, %v275_v3   ;;  %v280_v13 = vld [vmem:[%s901_s2 + $0x38] sm:$0xff] (!%p209_p3)  ;;  %v266_v14 = vld [vmem:[%s900_s1 + $0x10] sm:$0xff] (!%p209_p3)  ;;  %v321_v15 = vld [vmem:[%s903_s4] sm:$0x7] (!%p209_p3) }
   0xa   : > { %v267_v16 = vld [vmem:[%s900_s1 + $0x18] sm:$0xff] (!%p209_p3)  ;;  %v268_v17 = vld [vmem:[%s900_s1 + $0x20] sm:$0xff] (!%p209_p3)  ;;  %v269_v18 = vld [vmem:[%s900_s1 + $0x28] sm:$0xff] (!%p209_p3) }
   0xb   : > { %v270_v19 = vld [vmem:[%s900_s1 + $0x30] sm:$0xff] (!%p209_p3)  ;;  %v271_v20 = vld [vmem:[%s900_s1 + $0x38] sm:$0xff] (!%p209_p3) }
   0xd   : > { %288 = vperm.xlu0 (!%p209_p3), %738, %v274_v4   ;;  %298 = vperm.xlu1 (!%p209_p3), %739, %v276_v5  }
   0xe   : > { %s910_s18 = smov (!%p245_p4, %s755_s18), 1 }
   0xf   : > { %s694_s26 = sshll.u32 %s910_s18, 3 }
  0x10   : > { %s252_s29 = scalar_lea.vmem %s899_s0, %s694_s26  ;;  %s262_s23 = scalar_lea.vmem %s904_s5, %s694_s26 }
  0x11   : > { %v327_v6 = vld [vmem:[%s252_s29] sm:$0x77]  ;;  %303 = vperm.xlu0 %738, %v277_v9   ;;  %308 = vperm.xlu1 %739, %v278_v10  }
  0x12   : > { %v329_v7 = vcombine.high %v327_v6, %v327_v6 }
  0x14   : > { %681 = vmatprep.subr.msk.mxu0 %vm355_vm0, %v329_v7 }
  0x15   : > { %682 = vmatpush1.msk.msra.mxu0 %vm355_vm0, %v327_v6  ;;  %313 = vperm.xlu0 %738, %v279_v12  }
  0x16   : > { %683 = vmatmul.mubr.msk.f32.vlgmr.msra.gmra.mrb[0].mxu0 %vm330_vm1, %v264_v8  ;;  %318 = vperm.xlu1 %739, %v280_v13  }
  0x17   : > { %430 = vmatprep.mubr.f32.mxu0 %v765_v0 }
  0x19   : > { %324 = vperm.xlu0 %738, %v321_v15  }
  0x1a   : > { %684 = vmatmul.mubr.msk.f32.gmra.mrb[2].mxu0 %vm330_vm1, %v265_v11 }
  0x1b   : > { %436 = vmatprep.mubr.f32.mxu0 %v765_v0 }
  0x1e   : > { %685 = vmatmul.mubr.msk.f32.gmra.mrb[4].mxu0 %vm330_vm1, %v266_v14 }
  0x1f   : > { %442 = vmatprep.mubr.f32.mxu0 %v765_v0 }
  0x22   : > { %686 = vmatmul.mubr.msk.f32.gmra.mrb[6].mxu0 %vm330_vm1, %v267_v16 }
  0x23   : > { %448 = vmatprep.mubr.f32.mxu0 %v765_v0 }
  0x26   : > { %687 = vmatmul.mubr.msk.f32.gmra.mrb[8].mxu0 %vm330_vm1, %v268_v17 }
  0x27   : > { %454 = vmatprep.mubr.f32.mxu0 %v765_v0 }
  0x2a   : > { %688 = vmatmul.mubr.msk.f32.gmra.mrb[10].mxu0 %vm330_vm1, %v269_v18 }
  0x2b   : > { %460 = vmatprep.mubr.f32.mxu0 %v765_v0 }
  0x2e   : > { %689 = vmatmul.mubr.msk.f32.gmra.mrb[12].mxu0 %vm330_vm1, %v270_v19 }
  0x2f   : > { %466 = vmatprep.mubr.f32.mxu0 %v765_v0 }
  0x32   : > { %690 = vmatmul.mubr.msk.f32.gmra.mrb[14].mxu0 %vm330_vm1, %v271_v20 }
  0x88   : > { %v284_v21 = vpop.permute.xlu0 %283  ;;  %v294_v32 = vpop.permute.xlu1 %293 }
  0x8c   : > { %v289_v26 = vpop.permute.xlu0 %288  ;;  %v299_v45 = vpop.permute.xlu1 %298 }
  0x90   : > { %v304_v54 = vpop.permute.xlu0 %303  ;;  %v309_v1 = vpop.permute.xlu1 %308 }
  0x94   : > { %v314_v10 = vpop.permute.xlu0 %313 }
  0xe9   : > { %v426_v22 = vpop.f32.mrb[0].mxu0 }
  0xea   : > { %v427_v23 = vadd.f32 %v426_v22, %v284_v21  ;;  %v428_v24 = vpop.f32.mrb[1].mxu0 }
  0xeb   : > { %v429_v25 = vadd.f32 %v428_v24, %v284_v21  ;;  %v319_v21 = vpop.permute.xlu1 %318 }
  0xec   : > { %v473_v28 = vmul.f32 0.2, %v427_v23 }
  0xed   : > { %v432_v27 = vpop.f32.mrb[2].mxu0  ;;  %v474_v31 = vmul.f32 0.2, %v429_v25 }
  0xee   : > { %v433_v29 = vadd.f32 %v432_v27, %v289_v26  ;;  %v434_v30 = vpop.f32.mrb[3].mxu0  ;;  %v489_v37 = vmax.f32 %v427_v23, %v473_v28 }
  0xef   : > { %v435_v33 = vadd.f32 %v434_v30, %v289_v26  ;;  %v490_v42 = vmax.f32 %v429_v25, %v474_v31 }
  0xf0   : > { %v475_v34 = vmul.f32 0.2, %v433_v29 }
  0xf1   : > { %v476_v35 = vmul.f32 0.2, %v435_v33  ;;  %v438_v36 = vpop.f32.mrb[4].mxu0 }
  0xf2   : > { %v491_v38 = vmax.f32 %v433_v29, %v475_v34  ;;  %v439_v39 = vadd.f32 %v438_v36, %v294_v32  ;;  %v440_v40 = vpop.f32.mrb[5].mxu0 }
  0xf3   : > { %v441_v41 = vadd.f32 %v440_v40, %v294_v32  ;;  %v492_v43 = vmax.f32 %v435_v33, %v476_v35 }
  0xf4   : > { %v698_v44 = vpack.c.bf16 %v491_v38, %v489_v37  ;;  %v477_v48 = vmul.f32 0.2, %v439_v39  ;;  %v272_v37 = vld [vmem:[%s902_s3] sm:$0x7]  ;;  %v325_v38 = vpop.permute.xlu0 %324 }
  0xf5   : > { %v444_v46 = vpop.f32.mrb[6].mxu0  ;;  %v696_v47 = vpack.c.bf16 %v492_v43, %v490_v42  ;;  %v478_v51 = vmul.f32 0.2, %v441_v41 }
  0xf6   : > { %v445_v49 = vadd.f32 %v444_v46, %v299_v45  ;;  %v446_v50 = vpop.f32.mrb[7].mxu0  ;;  %v493_v57 = vmax.f32 %v439_v39, %v477_v48 }
  0xf7   : > { %v447_v52 = vadd.f32 %v446_v50, %v299_v45  ;;  %697 = vmatprep.subr.bf16.mxu1 %v696_v47  ;;  %v494_v61 = vmax.f32 %v441_v41, %v478_v51 }
  0xf8   : > { %v479_v53 = vmul.f32 0.2, %v445_v49  ;;  %699 = vmatpush1.bf16.msra.mxu1 %v698_v44 }
  0xf9   : > { %v480_v55 = vmul.f32 0.2, %v447_v52  ;;  %v450_v56 = vpop.f32.mrb[8].mxu0 }
  0xfa   : > { %v495_v58 = vmax.f32 %v445_v49, %v479_v53  ;;  %v451_v59 = vadd.f32 %v450_v56, %v304_v54  ;;  %v452_v60 = vpop.f32.mrb[9].mxu0 }
  0xfb   : > { %v496_v62 = vmax.f32 %v447_v52, %v480_v55  ;;  %v453_v63 = vadd.f32 %v452_v60, %v304_v54 }
  0xfc   : > { %v702_v0 = vpack.c.bf16 %v495_v58, %v493_v57  ;;  %v481_v4 = vmul.f32 0.2, %v451_v59 }
  0xfd   : > { %v456_v2 = vpop.f32.mrb[10].mxu0  ;;  %v700_v3 = vpack.c.bf16 %v496_v62, %v494_v61  ;;  %v482_v7 = vmul.f32 0.2, %v453_v63 }
  0xfe   : > { %v457_v5 = vadd.f32 %v456_v2, %v309_v1  ;;  %v458_v6 = vpop.f32.mrb[11].mxu0  ;;  %v497_v13 = vmax.f32 %v451_v59, %v481_v4 }
  0xff   : > { %v459_v8 = vadd.f32 %v458_v6, %v309_v1  ;;  %701 = vmatprep.subr.bf16.mxu1 %v700_v3  ;;  %v498_v17 = vmax.f32 %v453_v63, %v482_v7 }
 0x100   : > { %v483_v9 = vmul.f32 0.2, %v457_v5  ;;  %703 = vmatpush1.bf16.msra.mxu1 %v702_v0 }
 0x101   : > { %v484_v11 = vmul.f32 0.2, %v459_v8  ;;  %v462_v12 = vpop.f32.mrb[12].mxu0 }
 0x102   : > { %v499_v14 = vmax.f32 %v457_v5, %v483_v9  ;;  %v463_v15 = vadd.f32 %v462_v12, %v314_v10  ;;  %v464_v16 = vpop.f32.mrb[13].mxu0 }
 0x103   : > { %v500_v18 = vmax.f32 %v459_v8, %v484_v11  ;;  %v465_v19 = vadd.f32 %v464_v16, %v314_v10 }
 0x104   : > { %v706_v20 = vpack.c.bf16 %v499_v14, %v497_v13  ;;  %v485_v24 = vmul.f32 0.2, %v463_v15 }
 0x105   : > { %v468_v22 = vpop.f32.mrb[14].mxu0  ;;  %v704_v23 = vpack.c.bf16 %v500_v18, %v498_v17  ;;  %v486_v27 = vmul.f32 0.2, %v465_v19 }
 0x106   : > { %v469_v25 = vadd.f32 %v468_v22, %v319_v21  ;;  %v470_v26 = vpop.f32.mrb[15].mxu0  ;;  %v501_v31 = vmax.f32 %v463_v15, %v485_v24 }
 0x107   : > { %v471_v28 = vadd.f32 %v470_v26, %v319_v21  ;;  %705 = vmatprep.subr.bf16.mxu1 %v704_v23  ;;  %v502_v33 = vmax.f32 %v465_v19, %v486_v27 }
 0x108   : > { %v487_v29 = vmul.f32 0.2, %v469_v25  ;;  %707 = vmatpush1.bf16.msra.mxu1 %v706_v20 }
 0x109   : > { %v488_v30 = vmul.f32 0.2, %v471_v28 }
 0x10a   : > { %v503_v32 = vmax.f32 %v469_v25, %v487_v29 }
 0x10b   : > { %v504_v34 = vmax.f32 %v471_v28, %v488_v30 }
 0x10c   : > { %v710_v35 = vpack.c.bf16 %v503_v32, %v501_v31 }
 0x10d   : > { %v708_v36 = vpack.c.bf16 %v504_v34, %v502_v33 }
 0x10f   : > { %709 = vmatprep.subr.bf16.mxu1 %v708_v36 }
 0x110   : > { %711 = vmatpush1.bf16.msra.mxu1 %v710_v35 }
 0x113   : > { %691 = vmatmul.mubr.msk.f32.vlgmr.msra.gmra.mrb[0].mxu1 %vm505_vm2, %v272_v37 }
 0x1e6   : > { %v575_v39 = vpop.f32.mrb[0].mxu1 }
 0x1e7   : > { %v576_v40 = vadd.f32 %v575_v39, %v325_v38  ;;  %v577_v41 = vpop.f32.mrb[1].mxu1 }
 0x1e8   : > { %v578_v42 = vadd.f32 %v577_v41, %v325_v38 }
 0x1ea   : > { %v582_v43 = vcombine.low %v576_v40, %v578_v42 }
 0x1ec   : > { %584 = vst [vmem:[%s262_s23] sm:$0x77] %v582_v43 }
 0x1ed PF: > { %s15_s20 = sadd.s32 1, %s763_s20   ;;  %s905_s18 = smov %s759_s19 }
 0x1ee   : > { %p12_p5 = scmp.ge.s32.totalorder %s15_s20, 4   ;;  %s906_s19 = smov %s908_s21 }
 0x1f0   :  { %14 = sbr.rel (!%p12_p5) target bundleno = 2 (0x2), region = 70 }

</bundles_post_ra>
